<compile_context>
chip_gen: v7x
topology: tpu7x:2x2x1
jax: 0.10.0
libtpu: 0.0.40
codegen_flags: <defaults>
</compile_context>

<pallas_src>
import math
import functools

import jax
import jax.numpy as jnp
from jax import lax
from jax.experimental import pallas as pl
from jax.experimental.pallas import tpu as pltpu


def attention_kernel(x_ref, wqkv_t_ref, wo_t_ref, o_ref, *,
                     batch, seq_len, num_heads, head_dim, embed_dim, scale):
    # x is the whole flattened batch: (B*N, E).
    x = x_ref[...].astype(jnp.bfloat16)

    # Single fused QKV projection: (B*N, E) x (E, 3E) bf16 MXU matmul, f32 acc.
    qkv = jnp.dot(x, wqkv_t_ref[...], preferred_element_type=jnp.float32)  # (B*N, 3E) f32

    # Static lane slices; scale folded into q once, in f32.
    q = (qkv[:, :embed_dim] * scale).astype(jnp.bfloat16)
    k = qkv[:, embed_dim:2 * embed_dim].astype(jnp.bfloat16)
    v = qkv[:, 2 * embed_dim:3 * embed_dim].astype(jnp.bfloat16)

    # q_bh @ k_bh^T without an explicit transpose: contract the last dims.
    score_dnums = (((1,), (1,)), ((), ()))

    # B=2, H=4 -> 8 tiny (N,N) attention problems, statically unrolled.
    for b in range(batch):
        rows = slice(b * seq_len, (b + 1) * seq_len)
        out_b = jnp.zeros((seq_len, embed_dim), jnp.float32)
        for h in range(num_heads):
            cols = slice(h * head_dim, (h + 1) * head_dim)
            q_bh = q[rows, cols]                       # (N, D) bf16
            k_bh = k[rows, cols]
            v_bh = v[rows, cols]

            s = lax.dot_general(q_bh, k_bh, score_dnums,
                                preferred_element_type=jnp.float32)        # (N, N) f32

            # Softmax in f32; divide moved onto the EUP via approx reciprocal.
            m = jnp.max(s, axis=-1, keepdims=True)
            p = jnp.exp(s - m)
            denom = jnp.sum(p, axis=-1, keepdims=True)
            p = (p * pl.reciprocal(denom, approx=True)).astype(jnp.bfloat16)

            o_bh = jnp.dot(p, v_bh,
                           preferred_element_type=jnp.float32).astype(jnp.bfloat16)  # (N, D)

            # Per-head out_proj slice, accumulated in f32 (no head concat / XLU shuffles).
            out_b = out_b + jnp.dot(o_bh, wo_t_ref[cols, :],
                                    preferred_element_type=jnp.float32)    # (N, E) f32

        o_ref[rows, :] = out_b.astype(o_ref.dtype)


def attention_forward(x, wq, wk, wv, wo, *, num_heads):
    """x: (B, N, E); wq/wk/wv/wo: (E, E) in nn.Linear (out_features, in_features) layout."""
    B, N, E = x.shape
    assert E % num_heads == 0
    D = E // num_heads
    scale = 1.0 / math.sqrt(D)

    # Pre-transpose (y = x @ W^T), fuse Q|K|V along the output axis, cast to bf16
    # once -> one (E, 3E) VMEM-resident weight tile + one (E, E) out_proj tile.
    wqkv_t = jnp.concatenate([wq.T, wk.T, wv.T], axis=1).astype(jnp.bfloat16)  # (E, 3E)
    wo_t = wo.T.astype(jnp.bfloat16)                                            # (E, E)

    # Flatten the batch so the projection is a single (B*N, E) matmul.
    x2d = x.reshape(B * N, E)

    kernel = functools.partial(attention_kernel,
                               batch=B, seq_len=N, num_heads=num_heads,
                               head_dim=D, embed_dim=E, scale=scale)

    flops = (2 * B * N * E * (3 * E)            # fused qkv projection
             + 2 * B * num_heads * N * N * D    # scores
             + 2 * B * num_heads * N * N * D    # p @ v
             + 2 * B * N * E * E)               # out projection
    transcendentals = B * num_heads * N * N     # exp
    bytes_accessed = (x2d.size * 4 + wqkv_t.size * 2 + wo_t.size * 2 + B * N * E * 4)

    out2d = pl.pallas_call(
        kernel,
        # No grid / BlockSpecs: whole (tiny) arrays live in VMEM for the single
        # invocation; no per-step pipelining overhead.
        out_shape=jax.ShapeDtypeStruct((B * N, E), x.dtype),
        cost_estimate=pl.CostEstimate(flops=flops,
                                      transcendentals=transcendentals,
                                      bytes_accessed=bytes_accessed),
    )(x2d, wqkv_t, wo_t)

    return out2d.reshape(B, N, E)


def attention_reference(x, wq, wk, wv, wo, *, num_heads):
    """Pure-JAX f32 reference matching the PyTorch forward (eval, SPLIT, non-causal)."""
    B, N, E = x.shape
    D = E // num_heads
    q = x @ wq.T
    k = x @ wk.T
    v = x @ wv.T
    # b n (h d) -> b h n d
    q = q.reshape(B, N, num_heads, D).transpose(0, 2, 1, 3)
    k = k.reshape(B, N, num_heads, D).transpose(0, 2, 1, 3)
    v = v.reshape(B, N, num_heads, D).transpose(0, 2, 1, 3)
    s = jnp.einsum("bhnd,bhmd->bhnm", q, k) / math.sqrt(D)
    p = jax.nn.softmax(s, axis=-1)
    o = jnp.einsum("bhnm,bhmd->bhnd", p, v)
    o = o.transpose(0, 2, 1, 3).reshape(B, N, E)
    return o @ wo.T


if __name__ == "__main__":
    # AttentionConfig(embed_dim=32, num_heads=4, qkv_strategy=SPLIT, bias=False,
    #                 causal=False, dropout=0.0); eval mode -> dropout is identity.
    B, N, E, H = 2, 8, 32, 4

    key = jax.random.PRNGKey(0)
    kx, kq, kk, kv, ko = jax.random.split(key, 5)

    x = jax.random.normal(kx, (B, N, E), dtype=jnp.float32)
    # Deterministic synthetic weights (xavier-like scale), nn.Linear (out, in) layout.
    std = 1.0 / math.sqrt(E)
    wq = jax.random.normal(kq, (E, E), dtype=jnp.float32) * std
    wk = jax.random.normal(kk, (E, E), dtype=jnp.float32) * std
    wv = jax.random.normal(kv, (E, E), dtype=jnp.float32) * std
    wo = jax.random.normal(ko, (E, E), dtype=jnp.float32) * std
    # NOTE: self.lambdas parameter is unused in the PyTorch forward -> omitted.

    out = attention_forward(x, wq, wk, wv, wo, num_heads=H)
    out = jax.block_until_ready(out)

    ref = attention_reference(x, wq, wk, wv, wo, num_heads=H)
    assert out.shape == (B, N, E)
    # Tolerance loosened vs. pure-f32 because MXU operands are bf16 (f32 accumulate)
    # and the softmax denom uses the approx EUP reciprocal.
    assert jnp.allclose(out, ref, atol=3e-2, rtol=3e-2), (
        f"max abs err {jnp.max(jnp.abs(out - ref))}")

    print("KERNEL_OK")
</pallas_src>

<mosaic_0001>
module attributes {stable_mosaic.version = 11 : i64} {
  func.func @attention_kernel(%arg0: memref<16x32xf32, #tpu.memory_space<vmem>>, %arg1: memref<32x96xbf16, #tpu.memory_space<vmem>>, %arg2: memref<32x32xbf16, #tpu.memory_space<vmem>>, %arg3: memref<16x32xf32, #tpu.memory_space<vmem>>) attributes {dimension_semantics = [], scalar_prefetch = 0 : i64, scratch_operands = 0 : i64, tpu.core_type = #tpu.core_type<tc>} {
    %c0 = arith.constant 0 : index
    %c0_0 = arith.constant 0 : index
    %0 = vector.load %arg0[%c0, %c0_0] : memref<16x32xf32, #tpu.memory_space<vmem>>, vector<16x32xf32>
    %1 = arith.truncf %0 : vector<16x32xf32> to vector<16x32xbf16>
    %c0_1 = arith.constant 0 : index
    %c0_2 = arith.constant 0 : index
    %2 = vector.load %arg1[%c0_1, %c0_2] : memref<32x96xbf16, #tpu.memory_space<vmem>>, vector<32x96xbf16>
    %cst = arith.constant dense<0.000000e+00> : vector<16x96xf32>
    %3 = tpu.matmul %1, %2, %cst {dimension_numbers = #tpu.dot_dimension_numbers<[1], [0], [0], [1], [0, 0, 1, 1], [], []>} : vector<16x32xbf16>, vector<32x96xbf16>, vector<16x96xf32> -> vector<16x96xf32>
    %4 = vector.extract_strided_slice %3 {offsets = [0, 0], sizes = [16, 32], strides = [1, 1]} : vector<16x96xf32> to vector<16x32xf32>
    %cst_3 = arith.constant 0.353553385 : f32
    %5 = vector.broadcast %cst_3 : f32 to vector<16x32xf32>
    %6 = arith.mulf %4, %5 : vector<16x32xf32>
    %7 = arith.truncf %6 : vector<16x32xf32> to vector<16x32xbf16>
    %8 = vector.extract_strided_slice %3 {offsets = [0, 32], sizes = [16, 32], strides = [1, 1]} : vector<16x96xf32> to vector<16x32xf32>
    %9 = arith.truncf %8 : vector<16x32xf32> to vector<16x32xbf16>
    %10 = vector.extract_strided_slice %3 {offsets = [0, 64], sizes = [16, 32], strides = [1, 1]} : vector<16x96xf32> to vector<16x32xf32>
    %11 = arith.truncf %10 : vector<16x32xf32> to vector<16x32xbf16>
    %cst_4 = arith.constant 0.000000e+00 : f32
    %12 = vector.broadcast %cst_4 : f32 to vector<8x32xf32>
    %13 = vector.extract_strided_slice %7 {offsets = [0, 0], sizes = [8, 8], strides = [1, 1]} : vector<16x32xbf16> to vector<8x8xbf16>
    %14 = vector.extract_strided_slice %9 {offsets = [0, 0], sizes = [8, 8], strides = [1, 1]} : vector<16x32xbf16> to vector<8x8xbf16>
    %15 = vector.extract_strided_slice %11 {offsets = [0, 0], sizes = [8, 8], strides = [1, 1]} : vector<16x32xbf16> to vector<8x8xbf16>
    %cst_5 = arith.constant dense<0.000000e+00> : vector<8x8xf32>
    %16 = tpu.matmul %13, %14, %cst_5 {dimension_numbers = #tpu.dot_dimension_numbers<[1], [1], [0], [0], [0, 0, 1, 0], [], []>} : vector<8x8xbf16>, vector<8x8xbf16>, vector<8x8xf32> -> vector<8x8xf32>
    %cst_6 = arith.constant dense<0xFF800000> : vector<8xf32>
    %17 = vector.multi_reduction <maximumf>, %16, %cst_6 [1] : vector<8x8xf32> to vector<8xf32>
    %18 = vector.shape_cast %17 : vector<8xf32> to vector<8x1xf32>
    %19 = vector.broadcast %18 : vector<8x1xf32> to vector<8x8xf32>
    %20 = arith.subf %16, %19 : vector<8x8xf32>
    %21 = math.exp %20 : vector<8x8xf32>
    %cst_7 = arith.constant dense<0.000000e+00> : vector<8xf32>
    %22 = vector.multi_reduction <add>, %21, %cst_7 [1] : vector<8x8xf32> to vector<8xf32>
    %23 = vector.shape_cast %22 : vector<8xf32> to vector<8x1xf32>
    %24 = tpu.reciprocal %23 {approx = true} : vector<8x1xf32> -> vector<8x1xf32>
    %25 = vector.broadcast %24 : vector<8x1xf32> to vector<8x8xf32>
    %26 = arith.mulf %21, %25 : vector<8x8xf32>
    %27 = arith.truncf %26 : vector<8x8xf32> to vector<8x8xbf16>
    %cst_8 = arith.constant dense<0.000000e+00> : vector<8x8xf32>
    %28 = tpu.matmul %27, %15, %cst_8 {dimension_numbers = #tpu.dot_dimension_numbers<[1], [0], [0], [1], [0, 0, 1, 1], [], []>} : vector<8x8xbf16>, vector<8x8xbf16>, vector<8x8xf32> -> vector<8x8xf32>
    %29 = arith.truncf %28 : vector<8x8xf32> to vector<8x8xbf16>
    %c0_9 = arith.constant 0 : index
    %c0_10 = arith.constant 0 : index
    %30 = vector.load %arg2[%c0_9, %c0_10] : memref<32x32xbf16, #tpu.memory_space<vmem>>, vector<8x32xbf16>
    %cst_11 = arith.constant dense<0.000000e+00> : vector<8x32xf32>
    %31 = tpu.matmul %29, %30, %cst_11 {dimension_numbers = #tpu.dot_dimension_numbers<[1], [0], [0], [1], [0, 0, 1, 1], [], []>} : vector<8x8xbf16>, vector<8x32xbf16>, vector<8x32xf32> -> vector<8x32xf32>
    %32 = arith.addf %12, %31 : vector<8x32xf32>
    %33 = vector.extract_strided_slice %7 {offsets = [0, 8], sizes = [8, 8], strides = [1, 1]} : vector<16x32xbf16> to vector<8x8xbf16>
    %34 = vector.extract_strided_slice %9 {offsets = [0, 8], sizes = [8, 8], strides = [1, 1]} : vector<16x32xbf16> to vector<8x8xbf16>
    %35 = vector.extract_strided_slice %11 {offsets = [0, 8], sizes = [8, 8], strides = [1, 1]} : vector<16x32xbf16> to vector<8x8xbf16>
    %cst_12 = arith.constant dense<0.000000e+00> : vector<8x8xf32>
    %36 = tpu.matmul %33, %34, %cst_12 {dimension_numbers = #tpu.dot_dimension_numbers<[1], [1], [0], [0], [0, 0, 1, 0], [], []>} : vector<8x8xbf16>, vector<8x8xbf16>, vector<8x8xf32> -> vector<8x8xf32>
    %cst_13 = arith.constant dense<0xFF800000> : vector<8xf32>
    %37 = vector.multi_reduction <maximumf>, %36, %cst_13 [1] : vector<8x8xf32> to vector<8xf32>
    %38 = vector.shape_cast %37 : vector<8xf32> to vector<8x1xf32>
    %39 = vector.broadcast %38 : vector<8x1xf32> to vector<8x8xf32>
    %40 = arith.subf %36, %39 : vector<8x8xf32>
    %41 = math.exp %40 : vector<8x8xf32>
    %cst_14 = arith.constant dense<0.000000e+00> : vector<8xf32>
    %42 = vector.multi_reduction <add>, %41, %cst_14 [1] : vector<8x8xf32> to vector<8xf32>
    %43 = vector.shape_cast %42 : vector<8xf32> to vector<8x1xf32>
    %44 = tpu.reciprocal %43 {approx = true} : vector<8x1xf32> -> vector<8x1xf32>
    %45 = vector.broadcast %44 : vector<8x1xf32> to vector<8x8xf32>
    %46 = arith.mulf %41, %45 : vector<8x8xf32>
    %47 = arith.truncf %46 : vector<8x8xf32> to vector<8x8xbf16>
    %cst_15 = arith.constant dense<0.000000e+00> : vector<8x8xf32>
    %48 = tpu.matmul %47, %35, %cst_15 {dimension_numbers = #tpu.dot_dimension_numbers<[1], [0], [0], [1], [0, 0, 1, 1], [], []>} : vector<8x8xbf16>, vector<8x8xbf16>, vector<8x8xf32> -> vector<8x8xf32>
    %49 = arith.truncf %48 : vector<8x8xf32> to vector<8x8xbf16>
    %c8 = arith.constant 8 : index
    %c0_16 = arith.constant 0 : index
    %50 = vector.load %arg2[%c8, %c0_16] : memref<32x32xbf16, #tpu.memory_space<vmem>>, vector<8x32xbf16>
    %cst_17 = arith.constant dense<0.000000e+00> : vector<8x32xf32>
    %51 = tpu.matmul %49, %50, %cst_17 {dimension_numbers = #tpu.dot_dimension_numbers<[1], [0], [0], [1], [0, 0, 1, 1], [], []>} : vector<8x8xbf16>, vector<8x32xbf16>, vector<8x32xf32> -> vector<8x32xf32>
    %52 = arith.addf %32, %51 : vector<8x32xf32>
    %53 = vector.extract_strided_slice %7 {offsets = [0, 16], sizes = [8, 8], strides = [1, 1]} : vector<16x32xbf16> to vector<8x8xbf16>
    %54 = vector.extract_strided_slice %9 {offsets = [0, 16], sizes = [8, 8], strides = [1, 1]} : vector<16x32xbf16> to vector<8x8xbf16>
    %55 = vector.extract_strided_slice %11 {offsets = [0, 16], sizes = [8, 8], strides = [1, 1]} : vector<16x32xbf16> to vector<8x8xbf16>
    %cst_18 = arith.constant dense<0.000000e+00> : vector<8x8xf32>
    %56 = tpu.matmul %53, %54, %cst_18 {dimension_numbers = #tpu.dot_dimension_numbers<[1], [1], [0], [0], [0, 0, 1, 0], [], []>} : vector<8x8xbf16>, vector<8x8xbf16>, vector<8x8xf32> -> vector<8x8xf32>
    %cst_19 = arith.constant dense<0xFF800000> : vector<8xf32>
    %57 = vector.multi_reduction <maximumf>, %56, %cst_19 [1] : vector<8x8xf32> to vector<8xf32>
    %58 = vector.shape_cast %57 : vector<8xf32> to vector<8x1xf32>
    %59 = vector.broadcast %58 : vector<8x1xf32> to vector<8x8xf32>
    %60 = arith.subf %56, %59 : vector<8x8xf32>
    %61 = math.exp %60 : vector<8x8xf32>
    %cst_20 = arith.constant dense<0.000000e+00> : vector<8xf32>
    %62 = vector.multi_reduction <add>, %61, %cst_20 [1] : vector<8x8xf32> to vector<8xf32>
    %63 = vector.shape_cast %62 : vector<8xf32> to vector<8x1xf32>
    %64 = tpu.reciprocal %63 {approx = true} : vector<8x1xf32> -> vector<8x1xf32>
    %65 = vector.broadcast %64 : vector<8x1xf32> to vector<8x8xf32>
    %66 = arith.mulf %61, %65 : vector<8x8xf32>
    %67 = arith.truncf %66 : vector<8x8xf32> to vector<8x8xbf16>
    %cst_21 = arith.constant dense<0.000000e+00> : vector<8x8xf32>
    %68 = tpu.matmul %67, %55, %cst_21 {dimension_numbers = #tpu.dot_dimension_numbers<[1], [0], [0], [1], [0, 0, 1, 1], [], []>} : vector<8x8xbf16>, vector<8x8xbf16>, vector<8x8xf32> -> vector<8x8xf32>
    %69 = arith.truncf %68 : vector<8x8xf32> to vector<8x8xbf16>
    %c16 = arith.constant 16 : index
    %c0_22 = arith.constant 0 : index
    %70 = vector.load %arg2[%c16, %c0_22] : memref<32x32xbf16, #tpu.memory_space<vmem>>, vector<8x32xbf16>
    %cst_23 = arith.constant dense<0.000000e+00> : vector<8x32xf32>
    %71 = tpu.matmul %69, %70, %cst_23 {dimension_numbers = #tpu.dot_dimension_numbers<[1], [0], [0], [1], [0, 0, 1, 1], [], []>} : vector<8x8xbf16>, vector<8x32xbf16>, vector<8x32xf32> -> vector<8x32xf32>
    %72 = arith.addf %52, %71 : vector<8x32xf32>
    %73 = vector.extract_strided_slice %7 {offsets = [0, 24], sizes = [8, 8], strides = [1, 1]} : vector<16x32xbf16> to vector<8x8xbf16>
    %74 = vector.extract_strided_slice %9 {offsets = [0, 24], sizes = [8, 8], strides = [1, 1]} : vector<16x32xbf16> to vector<8x8xbf16>
    %75 = vector.extract_strided_slice %11 {offsets = [0, 24], sizes = [8, 8], strides = [1, 1]} : vector<16x32xbf16> to vector<8x8xbf16>
    %cst_24 = arith.constant dense<0.000000e+00> : vector<8x8xf32>
    %76 = tpu.matmul %73, %74, %cst_24 {dimension_numbers = #tpu.dot_dimension_numbers<[1], [1], [0], [0], [0, 0, 1, 0], [], []>} : vector<8x8xbf16>, vector<8x8xbf16>, vector<8x8xf32> -> vector<8x8xf32>
    %cst_25 = arith.constant dense<0xFF800000> : vector<8xf32>
    %77 = vector.multi_reduction <maximumf>, %76, %cst_25 [1] : vector<8x8xf32> to vector<8xf32>
    %78 = vector.shape_cast %77 : vector<8xf32> to vector<8x1xf32>
    %79 = vector.broadcast %78 : vector<8x1xf32> to vector<8x8xf32>
    %80 = arith.subf %76, %79 : vector<8x8xf32>
    %81 = math.exp %80 : vector<8x8xf32>
    %cst_26 = arith.constant dense<0.000000e+00> : vector<8xf32>
    %82 = vector.multi_reduction <add>, %81, %cst_26 [1] : vector<8x8xf32> to vector<8xf32>
    %83 = vector.shape_cast %82 : vector<8xf32> to vector<8x1xf32>
    %84 = tpu.reciprocal %83 {approx = true} : vector<8x1xf32> -> vector<8x1xf32>
    %85 = vector.broadcast %84 : vector<8x1xf32> to vector<8x8xf32>
    %86 = arith.mulf %81, %85 : vector<8x8xf32>
    %87 = arith.truncf %86 : vector<8x8xf32> to vector<8x8xbf16>
    %cst_27 = arith.constant dense<0.000000e+00> : vector<8x8xf32>
    %88 = tpu.matmul %87, %75, %cst_27 {dimension_numbers = #tpu.dot_dimension_numbers<[1], [0], [0], [1], [0, 0, 1, 1], [], []>} : vector<8x8xbf16>, vector<8x8xbf16>, vector<8x8xf32> -> vector<8x8xf32>
    %89 = arith.truncf %88 : vector<8x8xf32> to vector<8x8xbf16>
    %c24 = arith.constant 24 : index
    %c0_28 = arith.constant 0 : index
    %90 = vector.load %arg2[%c24, %c0_28] : memref<32x32xbf16, #tpu.memory_space<vmem>>, vector<8x32xbf16>
    %cst_29 = arith.constant dense<0.000000e+00> : vector<8x32xf32>
    %91 = tpu.matmul %89, %90, %cst_29 {dimension_numbers = #tpu.dot_dimension_numbers<[1], [0], [0], [1], [0, 0, 1, 1], [], []>} : vector<8x8xbf16>, vector<8x32xbf16>, vector<8x32xf32> -> vector<8x32xf32>
    %92 = arith.addf %72, %91 : vector<8x32xf32>
    %c0_30 = arith.constant 0 : index
    %c0_31 = arith.constant 0 : index
    %93 = vector.load %arg3[%c0_30, %c0_31] : memref<16x32xf32, #tpu.memory_space<vmem>>, vector<8x32xf32>
    tpu.vector_store %arg3[%c0_30, %c0_31], %92 {strides = array<i32>} : memref<16x32xf32, #tpu.memory_space<vmem>>, vector<8x32xf32>,
    %cst_32 = arith.constant 0.000000e+00 : f32
    %94 = vector.broadcast %cst_32 : f32 to vector<8x32xf32>
    %95 = vector.extract_strided_slice %7 {offsets = [8, 0], sizes = [8, 8], strides = [1, 1]} : vector<16x32xbf16> to vector<8x8xbf16>
    %96 = vector.extract_strided_slice %9 {offsets = [8, 0], sizes = [8, 8], strides = [1, 1]} : vector<16x32xbf16> to vector<8x8xbf16>
    %97 = vector.extract_strided_slice %11 {offsets = [8, 0], sizes = [8, 8], strides = [1, 1]} : vector<16x32xbf16> to vector<8x8xbf16>
    %cst_33 = arith.constant dense<0.000000e+00> : vector<8x8xf32>
    %98 = tpu.matmul %95, %96, %cst_33 {dimension_numbers = #tpu.dot_dimension_numbers<[1], [1], [0], [0], [0, 0, 1, 0], [], []>} : vector<8x8xbf16>, vector<8x8xbf16>, vector<8x8xf32> -> vector<8x8xf32>
    %cst_34 = arith.constant dense<0xFF800000> : vector<8xf32>
    %99 = vector.multi_reduction <maximumf>, %98, %cst_34 [1] : vector<8x8xf32> to vector<8xf32>
    %100 = vector.shape_cast %99 : vector<8xf32> to vector<8x1xf32>
    %101 = vector.broadcast %100 : vector<8x1xf32> to vector<8x8xf32>
    %102 = arith.subf %98, %101 : vector<8x8xf32>
    %103 = math.exp %102 : vector<8x8xf32>
    %cst_35 = arith.constant dense<0.000000e+00> : vector<8xf32>
    %104 = vector.multi_reduction <add>, %103, %cst_35 [1] : vector<8x8xf32> to vector<8xf32>
    %105 = vector.shape_cast %104 : vector<8xf32> to vector<8x1xf32>
    %106 = tpu.reciprocal %105 {approx = true} : vector<8x1xf32> -> vector<8x1xf32>
    %107 = vector.broadcast %106 : vector<8x1xf32> to vector<8x8xf32>
    %108 = arith.mulf %103, %107 : vector<8x8xf32>
    %109 = arith.truncf %108 : vector<8x8xf32> to vector<8x8xbf16>
    %cst_36 = arith.constant dense<0.000000e+00> : vector<8x8xf32>
    %110 = tpu.matmul %109, %97, %cst_36 {dimension_numbers = #tpu.dot_dimension_numbers<[1], [0], [0], [1], [0, 0, 1, 1], [], []>} : vector<8x8xbf16>, vector<8x8xbf16>, vector<8x8xf32> -> vector<8x8xf32>
    %111 = arith.truncf %110 : vector<8x8xf32> to vector<8x8xbf16>
    %c0_37 = arith.constant 0 : index
    %c0_38 = arith.constant 0 : index
    %112 = vector.load %arg2[%c0_37, %c0_38] : memref<32x32xbf16, #tpu.memory_space<vmem>>, vector<8x32xbf16>
    %cst_39 = arith.constant dense<0.000000e+00> : vector<8x32xf32>
    %113 = tpu.matmul %111, %112, %cst_39 {dimension_numbers = #tpu.dot_dimension_numbers<[1], [0], [0], [1], [0, 0, 1, 1], [], []>} : vector<8x8xbf16>, vector<8x32xbf16>, vector<8x32xf32> -> vector<8x32xf32>
    %114 = arith.addf %94, %113 : vector<8x32xf32>
    %115 = vector.extract_strided_slice %7 {offsets = [8, 8], sizes = [8, 8], strides = [1, 1]} : vector<16x32xbf16> to vector<8x8xbf16>
    %116 = vector.extract_strided_slice %9 {offsets = [8, 8], sizes = [8, 8], strides = [1, 1]} : vector<16x32xbf16> to vector<8x8xbf16>
    %117 = vector.extract_strided_slice %11 {offsets = [8, 8], sizes = [8, 8], strides = [1, 1]} : vector<16x32xbf16> to vector<8x8xbf16>
    %cst_40 = arith.constant dense<0.000000e+00> : vector<8x8xf32>
    %118 = tpu.matmul %115, %116, %cst_40 {dimension_numbers = #tpu.dot_dimension_numbers<[1], [1], [0], [0], [0, 0, 1, 0], [], []>} : vector<8x8xbf16>, vector<8x8xbf16>, vector<8x8xf32> -> vector<8x8xf32>
    %cst_41 = arith.constant dense<0xFF800000> : vector<8xf32>
    %119 = vector.multi_reduction <maximumf>, %118, %cst_41 [1] : vector<8x8xf32> to vector<8xf32>
    %120 = vector.shape_cast %119 : vector<8xf32> to vector<8x1xf32>
    %121 = vector.broadcast %120 : vector<8x1xf32> to vector<8x8xf32>
    %122 = arith.subf %118, %121 : vector<8x8xf32>
    %123 = math.exp %122 : vector<8x8xf32>
    %cst_42 = arith.constant dense<0.000000e+00> : vector<8xf32>
    %124 = vector.multi_reduction <add>, %123, %cst_42 [1] : vector<8x8xf32> to vector<8xf32>
    %125 = vector.shape_cast %124 : vector<8xf32> to vector<8x1xf32>
    %126 = tpu.reciprocal %125 {approx = true} : vector<8x1xf32> -> vector<8x1xf32>
    %127 = vector.broadcast %126 : vector<8x1xf32> to vector<8x8xf32>
    %128 = arith.mulf %123, %127 : vector<8x8xf32>
    %129 = arith.truncf %128 : vector<8x8xf32> to vector<8x8xbf16>
    %cst_43 = arith.constant dense<0.000000e+00> : vector<8x8xf32>
    %130 = tpu.matmul %129, %117, %cst_43 {dimension_numbers = #tpu.dot_dimension_numbers<[1], [0], [0], [1], [0, 0, 1, 1], [], []>} : vector<8x8xbf16>, vector<8x8xbf16>, vector<8x8xf32> -> vector<8x8xf32>
    %131 = arith.truncf %130 : vector<8x8xf32> to vector<8x8xbf16>
    %c8_44 = arith.constant 8 : index
    %c0_45 = arith.constant 0 : index
    %132 = vector.load %arg2[%c8_44, %c0_45] : memref<32x32xbf16, #tpu.memory_space<vmem>>, vector<8x32xbf16>
    %cst_46 = arith.constant dense<0.000000e+00> : vector<8x32xf32>
    %133 = tpu.matmul %131, %132, %cst_46 {dimension_numbers = #tpu.dot_dimension_numbers<[1], [0], [0], [1], [0, 0, 1, 1], [], []>} : vector<8x8xbf16>, vector<8x32xbf16>, vector<8x32xf32> -> vector<8x32xf32>
    %134 = arith.addf %114, %133 : vector<8x32xf32>
    %135 = vector.extract_strided_slice %7 {offsets = [8, 16], sizes = [8, 8], strides = [1, 1]} : vector<16x32xbf16> to vector<8x8xbf16>
    %136 = vector.extract_strided_slice %9 {offsets = [8, 16], sizes = [8, 8], strides = [1, 1]} : vector<16x32xbf16> to vector<8x8xbf16>
    %137 = vector.extract_strided_slice %11 {offsets = [8, 16], sizes = [8, 8], strides = [1, 1]} : vector<16x32xbf16> to vector<8x8xbf16>
    %cst_47 = arith.constant dense<0.000000e+00> : vector<8x8xf32>
    %138 = tpu.matmul %135, %136, %cst_47 {dimension_numbers = #tpu.dot_dimension_numbers<[1], [1], [0], [0], [0, 0, 1, 0], [], []>} : vector<8x8xbf16>, vector<8x8xbf16>, vector<8x8xf32> -> vector<8x8xf32>
    %cst_48 = arith.constant dense<0xFF800000> : vector<8xf32>
    %139 = vector.multi_reduction <maximumf>, %138, %cst_48 [1] : vector<8x8xf32> to vector<8xf32>
    %140 = vector.shape_cast %139 : vector<8xf32> to vector<8x1xf32>
    %141 = vector.broadcast %140 : vector<8x1xf32> to vector<8x8xf32>
    %142 = arith.subf %138, %141 : vector<8x8xf32>
    %143 = math.exp %142 : vector<8x8xf32>
    %cst_49 = arith.constant dense<0.000000e+00> : vector<8xf32>
    %144 = vector.multi_reduction <add>, %143, %cst_49 [1] : vector<8x8xf32> to vector<8xf32>
    %145 = vector.shape_cast %144 : vector<8xf32> to vector<8x1xf32>
    %146 = tpu.reciprocal %145 {approx = true} : vector<8x1xf32> -> vector<8x1xf32>
    %147 = vector.broadcast %146 : vector<8x1xf32> to vector<8x8xf32>
    %148 = arith.mulf %143, %147 : vector<8x8xf32>
    %149 = arith.truncf %148 : vector<8x8xf32> to vector<8x8xbf16>
    %cst_50 = arith.constant dense<0.000000e+00> : vector<8x8xf32>
    %150 = tpu.matmul %149, %137, %cst_50 {dimension_numbers = #tpu.dot_dimension_numbers<[1], [0], [0], [1], [0, 0, 1, 1], [], []>} : vector<8x8xbf16>, vector<8x8xbf16>, vector<8x8xf32> -> vector<8x8xf32>
    %151 = arith.truncf %150 : vector<8x8xf32> to vector<8x8xbf16>
    %c16_51 = arith.constant 16 : index
    %c0_52 = arith.constant 0 : index
    %152 = vector.load %arg2[%c16_51, %c0_52] : memref<32x32xbf16, #tpu.memory_space<vmem>>, vector<8x32xbf16>
    %cst_53 = arith.constant dense<0.000000e+00> : vector<8x32xf32>
    %153 = tpu.matmul %151, %152, %cst_53 {dimension_numbers = #tpu.dot_dimension_numbers<[1], [0], [0], [1], [0, 0, 1, 1], [], []>} : vector<8x8xbf16>, vector<8x32xbf16>, vector<8x32xf32> -> vector<8x32xf32>
    %154 = arith.addf %134, %153 : vector<8x32xf32>
    %155 = vector.extract_strided_slice %7 {offsets = [8, 24], sizes = [8, 8], strides = [1, 1]} : vector<16x32xbf16> to vector<8x8xbf16>
    %156 = vector.extract_strided_slice %9 {offsets = [8, 24], sizes = [8, 8], strides = [1, 1]} : vector<16x32xbf16> to vector<8x8xbf16>
    %157 = vector.extract_strided_slice %11 {offsets = [8, 24], sizes = [8, 8], strides = [1, 1]} : vector<16x32xbf16> to vector<8x8xbf16>
    %cst_54 = arith.constant dense<0.000000e+00> : vector<8x8xf32>
    %158 = tpu.matmul %155, %156, %cst_54 {dimension_numbers = #tpu.dot_dimension_numbers<[1], [1], [0], [0], [0, 0, 1, 0], [], []>} : vector<8x8xbf16>, vector<8x8xbf16>, vector<8x8xf32> -> vector<8x8xf32>
    %cst_55 = arith.constant dense<0xFF800000> : vector<8xf32>
    %159 = vector.multi_reduction <maximumf>, %158, %cst_55 [1] : vector<8x8xf32> to vector<8xf32>
    %160 = vector.shape_cast %159 : vector<8xf32> to vector<8x1xf32>
    %161 = vector.broadcast %160 : vector<8x1xf32> to vector<8x8xf32>
    %162 = arith.subf %158, %161 : vector<8x8xf32>
    %163 = math.exp %162 : vector<8x8xf32>
    %cst_56 = arith.constant dense<0.000000e+00> : vector<8xf32>
    %164 = vector.multi_reduction <add>, %163, %cst_56 [1] : vector<8x8xf32> to vector<8xf32>
    %165 = vector.shape_cast %164 : vector<8xf32> to vector<8x1xf32>
    %166 = tpu.reciprocal %165 {approx = true} : vector<8x1xf32> -> vector<8x1xf32>
    %167 = vector.broadcast %166 : vector<8x1xf32> to vector<8x8xf32>
    %168 = arith.mulf %163, %167 : vector<8x8xf32>
    %169 = arith.truncf %168 : vector<8x8xf32> to vector<8x8xbf16>
    %cst_57 = arith.constant dense<0.000000e+00> : vector<8x8xf32>
    %170 = tpu.matmul %169, %157, %cst_57 {dimension_numbers = #tpu.dot_dimension_numbers<[1], [0], [0], [1], [0, 0, 1, 1], [], []>} : vector<8x8xbf16>, vector<8x8xbf16>, vector<8x8xf32> -> vector<8x8xf32>
    %171 = arith.truncf %170 : vector<8x8xf32> to vector<8x8xbf16>
    %c24_58 = arith.constant 24 : index
    %c0_59 = arith.constant 0 : index
    %172 = vector.load %arg2[%c24_58, %c0_59] : memref<32x32xbf16, #tpu.memory_space<vmem>>, vector<8x32xbf16>
    %cst_60 = arith.constant dense<0.000000e+00> : vector<8x32xf32>
    %173 = tpu.matmul %171, %172, %cst_60 {dimension_numbers = #tpu.dot_dimension_numbers<[1], [0], [0], [1], [0, 0, 1, 1], [], []>} : vector<8x8xbf16>, vector<8x32xbf16>, vector<8x32xf32> -> vector<8x32xf32>
    %174 = arith.addf %154, %173 : vector<8x32xf32>
    %c8_61 = arith.constant 8 : index
    %c0_62 = arith.constant 0 : index
    %175 = vector.load %arg3[%c8_61, %c0_62] : memref<16x32xf32, #tpu.memory_space<vmem>>, vector<8x32xf32>
    tpu.vector_store %arg3[%c8_61, %c0_62], %174 {strides = array<i32>} : memref<16x32xf32, #tpu.memory_space<vmem>>, vector<8x32xf32>,
    return
  }
}

</mosaic_0001>

<bundles_post_ra>
// kernel: tpu_custom_call.1
= control target key start
LH: loop header
LB: loop body
LE: loop exit
PB: predicated region body
PF: predicated region fallthrough
CT: control target
= control target key end

     0   :  { %8 = vsyncpa [#allocation3], 0  ;;  %s2116_s0 = inlined_call_operand.hbm [shape: f32[16,32], index: 0, kind: input, shape index: {}]   ;;  %s2117_s1 = inlined_call_operand.hbm [shape: bf16[32,96], index: 1, kind: input, shape index: {}]   ;;  %s2118_s2 = inlined_call_operand.hbm [shape: bf16[32,32], index: 2, kind: input, shape index: {}]   ;;  %s2119_s3 = inlined_call_operand.hbm [shape: f32[16,32], index: 3, kind: output, shape index: {}]  }
   0x1   :  { %9 = vsyncpa [#allocation6], 0 }
   0x2   :  { %10 = vsyncpa [#allocation4], 0  ;;  %s1817_s12 = smov [#allocation5]   ;;  %s1723_s16 = scalar_lea.hbm %s2117_s1, 256 }
   0x3   :  { %s28_s13 = sshll.u32 %s1817_s12, 4  ;;  %p1724_p0 = scmp.ne.s32.totalorder %s2117_s1, %s1723_s16  ;;  %s29_s13 = int_to_ptr.vmem [resolvable:$true] %s28_s13 }
   0x4   :  { %p1727_p1 = scmp.lt.u32.totalorder %s1723_s16, %s2117_s1 }
   0x6   :  { %p1729_p2 = pnand %p1727_p1, %p1724_p0 }
   0x8   :  { %1732 = shalt.err (!%p1729_p2)
}
   0x9   :  { %s1733_s21 = scalar_lea.vmem %s29_s13, 256  ;;  %p1738_p4 = scmp.lt.s32.totalorder %s29_s13, %s29_s13 }
   0xa   :  { %p1734_p3 = scmp.ne.s32.totalorder %s29_s13, %s1733_s21  ;;  %p1739_p5 = scmp.lt.s32.totalorder %s1733_s21, %s1733_s21 }
   0xc   :  { %p1740_p6 = por %p1739_p5, %p1738_p4 }
   0xe   :  { %p1741_p7 = pnand %p1740_p6, %p1734_p3 }
  0x10   :  { %1744 = shalt.err (!%p1741_p7)
}
  0x11   :  { %s1818_s22 = smov 64   ;;  %s1819_s23 = smov 4  }
  0x12   :  { %34 = dma.hbm_to_vmem [thread:$0]  %s2117_s1, 256, %s29_s13, [#allocation6], %s1818_s22, %s1818_s22, %s1819_s23  }
  0x13   :  { %s1820_s26 = smov [#allocation2]   ;;  %s1745_s30 = scalar_lea.hbm %s2116_s0, 256 }
  0x14   :  { %s16_s27 = sshll.u32 %s1820_s26, 4  ;;  %p1746_p8 = scmp.ne.s32.totalorder %s2116_s0, %s1745_s30  ;;  %s17_s27 = int_to_ptr.vmem [resolvable:$true] %s16_s27 }
  0x15   :  { %p1749_p9 = scmp.lt.u32.totalorder %s1745_s30, %s2116_s0 }
  0x17   :  { %p1751_p10 = pnand %p1749_p9, %p1746_p8 }
  0x19   :  { %1754 = shalt.err (!%p1751_p10)
}
  0x1a   :  { %s1755_s8 = scalar_lea.vmem %s17_s27, 256  ;;  %p1760_p12 = scmp.lt.s32.totalorder %s17_s27, %s17_s27 }
  0x1b   :  { %p1756_p11 = scmp.ne.s32.totalorder %s17_s27, %s1755_s8  ;;  %p1761_p13 = scmp.lt.s32.totalorder %s1755_s8, %s1755_s8 }
  0x1d   :  { %p1762_p0 = por %p1761_p13, %p1760_p12 }
  0x1f   :  { %p1763_p1 = pnand %p1762_p0, %p1756_p11 }
  0x21   :  { %1766 = shalt.err (!%p1763_p1)
}
  0x22   :  { %s1821_s1 = smov 128   ;;  %s1822_s9 = smov 8  }
  0x23   :  { %22 = dma.hbm_to_vmem [thread:$0]  %s2116_s0, 256, %s17_s27, [#allocation3], %s1821_s1, %s1821_s1, %s1822_s9  }
  0x24   :  { %s1823_s12 = smov [#allocation7]   ;;  %s1767_s16 = scalar_lea.hbm %s2118_s2, 256 }
  0x25   :  { %s40_s13 = sshll.u32 %s1823_s12, 4  ;;  %p1768_p2 = scmp.ne.s32.totalorder %s2118_s2, %s1767_s16  ;;  %s41_s13 = int_to_ptr.vmem [resolvable:$true] %s40_s13 }
  0x26   :  { %p1771_p3 = scmp.lt.u32.totalorder %s1767_s16, %s2118_s2 }
  0x28   :  { %p1773_p4 = pnand %p1771_p3, %p1768_p2 }
  0x2a   :  { %1776 = shalt.err (!%p1773_p4)
}
  0x2b   :  { %s1777_s21 = scalar_lea.vmem %s41_s13, 256  ;;  %p1782_p6 = scmp.lt.s32.totalorder %s41_s13, %s41_s13 }
  0x2c   :  { %p1778_p5 = scmp.ne.s32.totalorder %s41_s13, %s1777_s21  ;;  %p1783_p7 = scmp.lt.s32.totalorder %s1777_s21, %s1777_s21 }
  0x2e   :  { %p1784_p8 = por %p1783_p7, %p1782_p6 }
  0x30   :  { %p1785_p9 = pnand %p1784_p8, %p1778_p5 }
  0x32   :  { %1788 = shalt.err (!%p1785_p9)
}
  0x33   :  { %46 = dma.hbm_to_vmem [thread:$0]  %s2118_s2, 256, %s41_s13, [#allocation6], %s1818_s22, %s1818_s22, %s1819_s23  }
  0x34   :  { %1811 = dma.done.wait [#allocation3], 256  }
  0x35   :  { %1812 = vsyncadd [#allocation3], 4294967040 }
  0x36   :  { %1813 = dma.done.wait [#allocation6], 512  }
  0x37   :  { %1814 = vsyncadd [#allocation6], 4294966784  ;;  %v1824_v0 = vmov 0.0   ;;  %vm1825_vm0 = vmmov 0   ;;  %v1689_v1 = vld [vmem:[#allocation5] sm:$0xff]   ;;  %v1690_v2 = vld [vmem:[#allocation5 + $0x8] sm:$0xff]  }
  0x38   :  { %1493 = vmatprep.subr.bf16.mxu0 %v1824_v0  ;;  %1497 = vmatprep.mubr.msk.bf16.mxu0 %vm1825_vm0, %v1824_v0  ;;  %v57_v3 = vld [vmem:[#allocation2] sm:$0xff]  ;;  %v58_v4 = vld [vmem:[#allocation2 + $0x8] sm:$0xff]  ;;  %vm76_vm1 = vcmask 261120   ;;  %s1826_s2 = smov 96   ;;  %s1827_s23 = smov 120   ;;  %vm128_vm2 = vcmask 64512  }
  0x39   :  { %1501 = vmatprep.subr.bf16.mxu1 %v1824_v0  ;;  %1503 = vmatprep.mubr.msk.bf16.mxu1 %vm1825_vm0, %v1824_v0  ;;  %v59_v5 = vpack.c.bf16 %v58_v4, %v57_v3  ;;  %s1828_s25 = smov 88   ;;  %s1829_s26 = smov 56   ;;  %vm192_vm3 = vcmask 1043456   ;;  %v350_v54 = vld [vmem:[#allocation7 + $0x4] sm:$0xf] }
  0x3a   :  { %1494 = vmatpush3.bf16.msra.mxu0 %v1689_v1  ;;  %s1830_s27 = smov 80   ;;  %s1831_s28 = smov 112   ;;  %v355_v55 = vsel %vm192_vm3, %v350_v54, 0  ;;  %v237_v60 = vld [vmem:[#allocation7] sm:$0xf] }
  0x3b   :  { %1495 = vmatprep.subr.bf16.mxu0 %v1824_v0  ;;  %v401_v1 = vsel %vm192_vm3, %v237_v60, 0  ;;  %s1832_s29 = smov 72   ;;  %s1833_s30 = smov 104  }
  0x3c   :  { %s1834_s4 = smov 48   ;;  %s1835_s5 = smov 40  }
  0x3e   :  { %1496 = vmatpush3.bf16.msra.mxu0 %v1690_v2 }
  0x3f   :  { %1507 = vmatprep.subr.bf16.mxu0 %v1824_v0 }
  0x41   :  { %1498 = vmatmul.mubr.msk.bf16.vlgmr.msra.gmra.mrb[0].mxu0 %vm76_vm1, %v59_v5 }
  0x42   :  { %1509 = vmatprep.mubr.msk.bf16.mxu0 %vm1825_vm0, %v1824_v0 }
 0x114   :  { %v114_v6 = vpop.f32.mrb[0].mxu0 }
 0x115   :  { %v1499_v7 = vpop.f32.mrb[1].mxu0  ;;  %v121_v9 = vmul.f32 0.35355338, %v114_v6 }
 0x116   :  { %v117_v8 = vpop.f32.mrb[2].mxu0 }
 0x117   :  { %v122_v10 = vmul.f32 0.35355338, %v117_v8  ;;  %v1913_v11 = vpack.c.bf16 %v117_v8, %v114_v6  ;;  %v1500_v12 = vpop.f32.mrb[3].mxu0 }
 0x119   :  { %v1915_v13 = vpack.c.bf16 %v122_v10, %v121_v9  ;;  %126 = vrot.lane.b32.xlu0 %v1913_v11, %s1826_s2 }
 0x11b   :  { %239 = vrot.lane.b32.xlu1 %v1915_v13, %s1827_s23 }
 0x11d   :  { %241 = vrot.lane.b32.xlu0 %v1913_v11, %s1828_s25 }
 0x18b   :  { %v127_v14 = vpop.permute.xlu0 %126 }
 0x18c   :  { %v133_v15 = vsel %vm128_vm2, %v127_v14, 0 }
 0x18d   :  { %1502 = vmatpush3.bf16.xpose.msra.mxu1 %v133_v15  ;;  %v240_v18 = vpop.permute.xlu1 %239 }
 0x18e   :  { %1513 = vmatprep.subr.bf16.mxu1 %v1824_v0 }
 0x18f   :  { %v242_v16 = vpop.permute.xlu0 %241 }
 0x190   :  { %v247_v17 = vsel %vm128_vm2, %v242_v16, 0 }
 0x194   :  { %1504 = vmatmul.mubr.msk.bf16.vlgmr.msra.gmra.mrb[0].mxu1 %vm128_vm2, %v1915_v13 }
 0x195   :  { %1514 = vmatpush3.bf16.xpose.msra.mxu1 %v247_v17  ;;  %1515 = vmatprep.mubr.msk.bf16.mxu1 %vm1825_vm0, %v1824_v0 }
 0x196   :  { %1525 = vmatprep.subr.bf16.mxu1 %v1824_v0 }
 0x19c   :  { %1516 = vmatmul.mubr.msk.bf16.vlgmr.msra.gmra.mrb[4].mxu1 %vm128_vm2, %v240_v18 }
 0x19d   :  { %1527 = vmatprep.mubr.msk.bf16.mxu1 %vm1825_vm0, %v1824_v0  ;;  %1526 = vmatpush3.bf16.msra.mxu1 %v355_v55 }
 0x19e   :  { %1531 = vmatprep.subr.bf16.mxu1 %v1824_v0 }
 0x267   :  { %v169_v19 = vpop.f32.mrb[0].mxu1 }
 0x268   :  { %v1505_v20 = vpop.f32.mrb[1].mxu1  ;;  %v175_v21 = vsel %vm128_vm2, %v169_v19, -inf }
 0x269   :  { %176 = vmax.xlane.f32.xlu1 %v175_v21  ;;  %v172_v22 = vpop.f32.mrb[2].mxu1 }
 0x26a   :  { %v1506_v23 = vpop.f32.mrb[3].mxu1 }
 0x26f   :  { %v283_v24 = vpop.f32.mrb[4].mxu1 }
 0x270   :  { %v1517_v25 = vpop.f32.mrb[5].mxu1  ;;  %v289_v26 = vsel %vm128_vm2, %v283_v24, -inf }
 0x271   :  { %290 = vmax.xlane.f32.xlu0 %v289_v26  ;;  %v286_v27 = vpop.f32.mrb[6].mxu1  ;;  %v554_v26 = vld [vmem:[#allocation7 + $0x8] sm:$0xf] }
 0x272   :  { %v1518_v28 = vpop.f32.mrb[7].mxu1  ;;  %v559_v27 = vsel %vm192_vm3, %v554_v26, 0 }
 0x27a   :  { %301 = vrot.lane.b32.xlu1 %v1913_v11, %s1829_s26 }
 0x2f6   :  { %v177_v29 = vpop.xlane.xlu1 %176 }
 0x2f7   :  { %v178_v30 = vsub.f32 %v169_v19, %v177_v29 }
 0x2f9   :  { %v179_v31 = vmul.f32 1.442695, %v178_v30 }
 0x2fa   :  { %v302_v40 = vpop.permute.xlu1 %301 }
 0x2fb   :  { %1691 = vpow2.f32 %v179_v31  ;;  %v307_v47 = vsel %vm192_vm3, %v302_v40, 0 }
 0x2fe   :  { %v291_v32 = vpop.xlane.xlu0 %290 }
 0x2ff   :  { %v292_v33 = vsub.f32 %v283_v24, %v291_v32 }
 0x301   :  { %v293_v34 = vmul.f32 1.442695, %v292_v33 }
 0x303   :  { %1693 = vpow2.f32 %v293_v34 }
 0x305   :  { %v1692_v35 = vpop.eup %1691 }
 0x306   :  { %v181_v36 = vsel %vm128_vm2, %v1692_v35, 0.0 }
 0x307   :  { %182 = vadd.xlane.f32.xlu0 %v181_v36 }
 0x30d   :  { %v1694_v37 = vpop.eup %1693 }
 0x30e   :  { %v295_v38 = vsel %vm128_vm2, %v1694_v37, 0.0 }
 0x30f   :  { %296 = vadd.xlane.f32.xlu1 %v295_v38  ;;  %v1998_v38 = vrot.slane %v1913_v11, 4 }
 0x31d   :  { %187 = vrot.lane.b32.xlu0 %v1913_v11, %s1818_s22 }
 0x320   :  { %445 = vrot.lane.b32.xlu1 %v1913_v11, %s1830_s27 }
 0x321   :  { %443 = vrot.lane.b32.xlu0 %v1915_v13, %s1831_s28 }
 0x394   :  { %v183_v39 = vpop.xlane.xlu0 %182 }
 0x395   :  { %1695 = vrcp.f32 %v183_v39 }
 0x398   :  { %v188_v41 = vpop.permute.xlu0 %187 }
 0x399   :  { %v194_v42 = vsel %vm192_vm3, %v188_v41, 0 }
 0x39a   :  { %1508 = vmatpush3.bf16.msra.mxu0 %v194_v42 }
 0x39b   :  { %1519 = vmatprep.subr.bf16.mxu0 %v1824_v0 }
 0x39c   :  { %v297_v43 = vpop.xlane.xlu1 %296  ;;  %v444_v53 = vpop.permute.xlu0 %443 }
 0x39d   :  { %1697 = vrcp.f32 %v297_v43 }
 0x39f   :  { %v1696_v44 = vpop.eup %1695 }
 0x3a0   :  { %v185_v45 = vmul.f32 %v1696_v44, %v1692_v35  ;;  %v446_v50 = vpop.permute.xlu1 %445 }
 0x3a1   :  { %v451_v52 = vsel %vm128_vm2, %v446_v50, 0  ;;  %v713_v50 = vld [vmem:[#allocation7 + $0xc] sm:$0xf] }
 0x3a2   :  { %v186_v46 = vpack.c.bf16 %v185_v45, %v185_v45 }
 0x3a4   :  { %1510 = vmatmul.mubr.msk.bf16.vlgmr.msra.gmra.mrb[4].mxu0 %vm128_vm2, %v186_v46 }
 0x3a5   :  { %1520 = vmatpush3.bf16.msra.mxu0 %v307_v47  ;;  %1521 = vmatprep.mubr.msk.bf16.mxu0 %vm1825_vm0, %v1824_v0 }
 0x3a6   :  { %1537 = vmatprep.subr.bf16.mxu0 %v1824_v0 }
 0x3a7   :  { %v1698_v48 = vpop.eup %1697 }
 0x3a8   :  { %v299_v49 = vmul.f32 %v1698_v48, %v1694_v37 }
 0x3aa   :  { %v300_v51 = vpack.c.bf16 %v299_v49, %v299_v49 }
 0x3ac   :  { %1522 = vmatmul.mubr.msk.bf16.vlgmr.msra.gmra.mrb[8].mxu0 %vm128_vm2, %v300_v51 }
 0x3ad   :  { %1539 = vmatprep.mubr.msk.bf16.mxu0 %vm1825_vm0, %v1824_v0 }
 0x3ae   :  { %1538 = vmatpush3.bf16.xpose.msra.mxu0 %v451_v52 }
 0x3af   :  { %1543 = vmatprep.subr.bf16.mxu0 %v1824_v0 }
 0x3b5   :  { %1540 = vmatmul.mubr.msk.bf16.vlgmr.msra.gmra.mrb[12].mxu0 %vm128_vm2, %v444_v53 }
 0x3b6   :  { %1545 = vmatprep.mubr.msk.bf16.mxu0 %vm1825_vm0, %v1824_v0 }
 0x477   :  { %v230_v56 = vpop.f32.mrb[4].mxu0 }
 0x478   :  { %v1511_v57 = vpop.f32.mrb[5].mxu0  ;;  %v236_v9 = vpack.c.bf16 %v230_v56, %v230_v56 }
 0x479   :  { %v233_v58 = vpop.f32.mrb[6].mxu0 }
 0x47a   :  { %v1512_v59 = vpop.f32.mrb[7].mxu0 }
 0x47f   :  { %v343_v61 = vpop.f32.mrb[8].mxu0 }
 0x480   :  { %v349_v62 = vpack.c.bf16 %v343_v61, %v343_v61  ;;  %v1523_v63 = vpop.f32.mrb[9].mxu0 }
 0x481   :  { %v346_v2 = vpop.f32.mrb[10].mxu0 }
 0x482   :  { %v1524_v3 = vpop.f32.mrb[11].mxu0  ;;  %1528 = vmatmul.mubr.msk.bf16.vlgmr.msra.gmra.mrb[8].mxu1 %vm128_vm2, %v349_v62 }
 0x483   :  { %1532 = vmatpush3.bf16.msra.mxu1 %v401_v1  ;;  %1533 = vmatprep.mubr.msk.bf16.mxu1 %vm1825_vm0, %v1824_v0 }
 0x484   :  { %1549 = vmatprep.subr.bf16.mxu1 %v1824_v0 }
 0x488   :  { %v487_v4 = vpop.f32.mrb[12].mxu0 }
 0x489   :  { %v1541_v5 = vpop.f32.mrb[13].mxu0  ;;  %v493_v6 = vsel %vm128_vm2, %v487_v4, -inf }
 0x48a   :  { %494 = vmax.xlane.f32.xlu1 %v493_v6  ;;  %v490_v7 = vpop.f32.mrb[14].mxu0 }
 0x48b   :  { %v1542_v8 = vpop.f32.mrb[15].mxu0 }
 0x48e   :  { %1534 = vmatmul.mubr.msk.bf16.vlgmr.msra.gmra.mrb[8].mxu1 %vm128_vm2, %v236_v9 }
 0x48f   :  { %1551 = vmatprep.mubr.msk.bf16.mxu1 %vm1825_vm0, %v1824_v0  ;;  %1550 = vmatpush3.bf16.msra.mxu1 %v559_v27 }
 0x490   :  { %1561 = vmatprep.subr.bf16.mxu1 %v1824_v0 }
 0x49b   :  { %604 = vrot.lane.b32.xlu1 %v1913_v11, %s1832_s29 }
 0x49f   :  { %602 = vrot.lane.b32.xlu1 %v1915_v13, %s1833_s30 }
 0x517   :  { %v495_v10 = vpop.xlane.xlu1 %494 }
 0x518   :  { %v496_v12 = vsub.f32 %v487_v4, %v495_v10 }
 0x51a   :  { %v497_v14 = vmul.f32 1.442695, %v496_v12 }
 0x51b   :  { %v605_v22 = vpop.permute.xlu1 %604 }
 0x51c   :  { %1699 = vpow2.f32 %v497_v14  ;;  %v610_v24 = vsel %vm128_vm2, %v605_v22, 0 }
 0x51f   :  { %v603_v25 = vpop.permute.xlu1 %602 }
 0x526   :  { %v1700_v15 = vpop.eup %1699 }
 0x527   :  { %v499_v16 = vsel %vm128_vm2, %v1700_v15, 0.0 }
 0x528   :  { %500 = vadd.xlane.f32.xlu0 %v499_v16 }
 0x53e   :  { %505 = vrot.lane.b32.xlu0 %v1913_v11, %s1834_s4 }
 0x5b5   :  { %v501_v17 = vpop.xlane.xlu0 %500 }
 0x5b6   :  { %1701 = vrcp.f32 %v501_v17 }
 0x5b9   :  { %v506_v18 = vpop.permute.xlu0 %505 }
 0x5ba   :  { %v511_v19 = vsel %vm192_vm3, %v506_v18, 0 }
 0x5bb   :  { %1544 = vmatpush3.bf16.msra.mxu0 %v511_v19 }
 0x5bc   :  { %1555 = vmatprep.subr.bf16.mxu0 %v1824_v0 }
 0x5c0   :  { %v1702_v20 = vpop.eup %1701 }
 0x5c1   :  { %v503_v21 = vmul.f32 %v1702_v20, %v1700_v15 }
 0x5c3   :  { %v504_v23 = vpack.c.bf16 %v503_v21, %v503_v21 }
 0x5c5   :  { %1546 = vmatmul.mubr.msk.bf16.vlgmr.msra.gmra.mrb[16].mxu0 %vm128_vm2, %v504_v23 }
 0x5c6   :  { %1556 = vmatpush3.bf16.xpose.msra.mxu0 %v610_v24  ;;  %1557 = vmatprep.mubr.msk.bf16.mxu0 %vm1825_vm0, %v1824_v0 }
 0x5c7   :  { %1573 = vmatprep.subr.bf16.mxu0 %v1824_v0 }
 0x5cd   :  { %1558 = vmatmul.mubr.msk.bf16.vlgmr.msra.gmra.mrb[20].mxu0 %vm128_vm2, %v603_v25 }
 0x5ce   :  { %1575 = vmatprep.mubr.msk.bf16.mxu0 %vm1825_vm0, %v1824_v0 }
 0x698   :  { %v547_v28 = vpop.f32.mrb[16].mxu0 }
 0x699   :  { %v553_v29 = vpack.c.bf16 %v547_v28, %v547_v28  ;;  %v1547_v30 = vpop.f32.mrb[17].mxu0 }
 0x69a   :  { %v550_v31 = vpop.f32.mrb[18].mxu0 }
 0x69b   :  { %v1548_v32 = vpop.f32.mrb[19].mxu0  ;;  %1552 = vmatmul.mubr.msk.bf16.vlgmr.msra.gmra.mrb[8].mxu1 %vm128_vm2, %v553_v29 }
 0x69c   :  { %1563 = vmatprep.mubr.msk.bf16.mxu1 %vm1825_vm0, %v1824_v0 }
 0x6a0   :  { %v646_v33 = vpop.f32.mrb[20].mxu0 }
 0x6a1   :  { %v1559_v34 = vpop.f32.mrb[21].mxu0  ;;  %v652_v35 = vsel %vm128_vm2, %v646_v33, -inf }
 0x6a2   :  { %653 = vmax.xlane.f32.xlu0 %v652_v35  ;;  %v649_v36 = vpop.f32.mrb[22].mxu0 }
 0x6a3   :  { %v1560_v37 = vpop.f32.mrb[23].mxu0 }
 0x6b8   :  { %664 = vrot.lane.b32.xlu0 %v1913_v11, %s1835_s5  ;;  %v2008_v11 = vrot.slane %v1915_v13, 4  ;;  %v718_v13 = vsel %vm192_vm3, %v713_v50, 0 }
 0x6bc   :  { %876 = vrot.lane.b32.xlu0 %v1998_v38, %s1828_s25 }
 0x72f   :  { %v654_v39 = vpop.xlane.xlu0 %653 }
 0x730   :  { %v655_v40 = vsub.f32 %v646_v33, %v654_v39 }
 0x732   :  { %v656_v41 = vmul.f32 1.442695, %v655_v40 }
 0x733   :  { %v665_v42 = vpop.permute.xlu0 %664 }
 0x734   :  { %1703 = vpow2.f32 %v656_v41  ;;  %v670_v43 = vsel %vm192_vm3, %v665_v42, 0 }
 0x735   :  { %1562 = vmatpush3.bf16.msra.mxu1 %v670_v43 }
 0x736   :  { %1567 = vmatprep.subr.bf16.mxu1 %v1824_v0 }
 0x737   :  { %v877_v56 = vpop.permute.xlu0 %876 }
 0x738   :  { %v882_v63 = vsel %vm128_vm2, %v877_v56, 0 }
 0x73e   :  { %v1704_v44 = vpop.eup %1703 }
 0x73f   :  { %v658_v45 = vsel %vm128_vm2, %v1704_v44, 0.0 }
 0x740   :  { %659 = vadd.xlane.f32.xlu1 %v658_v45 }
 0x751   :  { %764 = vrot.lane.b32.xlu1 %v1998_v38, %s1826_s2 }
 0x755   :  { %874 = vrot.lane.b32.xlu1 %v2008_v11, %s1827_s23 }
 0x7cd   :  { %v660_v46 = vpop.xlane.xlu1 %659 }
 0x7ce   :  { %1705 = vrcp.f32 %v660_v46  ;;  %v873_v46 = vld [vmem:[#allocation7] sm:$0xf] }
 0x7cf   :  { %v1036_v50 = vsel %vm192_vm3, %v873_v46, 0 }
 0x7d1   :  { %v765_v47 = vpop.permute.xlu1 %764 }
 0x7d2   :  { %v770_v48 = vsel %vm128_vm2, %v765_v47, 0 }
 0x7d3   :  { %1574 = vmatpush3.bf16.xpose.msra.mxu0 %v770_v48 }
 0x7d4   :  { %1579 = vmatprep.subr.bf16.mxu0 %v1824_v0 }
 0x7d5   :  { %v875_v2 = vpop.permute.xlu1 %874 }
 0x7d8   :  { %v1706_v49 = vpop.eup %1705 }
 0x7d9   :  { %v662_v51 = vmul.f32 %v1706_v49, %v1704_v44  ;;  %v985_v44 = vld [vmem:[#allocation7 + $0x4] sm:$0xf] }
 0x7da   :  { %1576 = vmatmul.mubr.msk.bf16.vlgmr.msra.gmra.mrb[24].mxu0 %vm128_vm2, %v2008_v11  ;;  %v990_v45 = vsel %vm192_vm3, %v985_v44, 0 }
 0x7db   :  { %v663_v52 = vpack.c.bf16 %v662_v51, %v662_v51  ;;  %1581 = vmatprep.mubr.msk.bf16.mxu0 %vm1825_vm0, %v1824_v0 }
 0x7dd   :  { %1564 = vmatmul.mubr.msk.bf16.vlgmr.msra.gmra.mrb[12].mxu1 %vm128_vm2, %v663_v52 }
 0x7de   :  { %1568 = vmatpush3.bf16.msra.mxu1 %v718_v13  ;;  %1569 = vmatprep.mubr.msk.bf16.mxu1 %vm1825_vm0, %v1824_v0 }
 0x7df   :  { %1585 = vmatprep.subr.bf16.mxu1 %v1824_v0 }
 0x8ad   :  { %v806_v53 = vpop.f32.mrb[24].mxu0 }
 0x8ae   :  { %v1577_v54 = vpop.f32.mrb[25].mxu0  ;;  %v812_v55 = vsel %vm128_vm2, %v806_v53, -inf }
 0x8af   :  { %813 = vmax.xlane.f32.xlu0 %v812_v55  ;;  %v809_v57 = vpop.f32.mrb[26].mxu0 }
 0x8b0   :  { %v706_v58 = vpop.f32.mrb[12].mxu1  ;;  %v1578_v59 = vpop.f32.mrb[27].mxu0 }
 0x8b1   :  { %v712_v60 = vpack.c.bf16 %v706_v58, %v706_v58  ;;  %v1565_v61 = vpop.f32.mrb[13].mxu1 }
 0x8b2   :  { %v709_v62 = vpop.f32.mrb[14].mxu1 }
 0x8b3   :  { %v1566_v1 = vpop.f32.mrb[15].mxu1  ;;  %1570 = vmatmul.mubr.msk.bf16.vlgmr.msra.gmra.mrb[8].mxu1 %vm128_vm2, %v712_v60 }
 0x8b4   :  { %1586 = vmatpush3.bf16.xpose.msra.mxu1 %v882_v63  ;;  %1587 = vmatprep.mubr.msk.bf16.mxu1 %vm1825_vm0, %v1824_v0 }
 0x8b5   :  { %1597 = vmatprep.subr.bf16.mxu1 %v1824_v0 }
 0x8bb   :  { %1588 = vmatmul.mubr.msk.bf16.vlgmr.msra.gmra.mrb[16].mxu1 %vm128_vm2, %v875_v2 }
 0x8bc   :  { %1599 = vmatprep.mubr.msk.bf16.mxu1 %vm1825_vm0, %v1824_v0  ;;  %1598 = vmatpush3.bf16.msra.mxu1 %v990_v45 }
 0x8bd   :  { %1603 = vmatprep.subr.bf16.mxu1 %v1824_v0 }
 0x93c   :  { %v814_v3 = vpop.xlane.xlu0 %813 }
 0x93d   :  { %v815_v4 = vsub.f32 %v806_v53, %v814_v3 }
 0x93f   :  { %v816_v5 = vmul.f32 1.442695, %v815_v4 }
 0x941   :  { %1707 = vpow2.f32 %v816_v5 }
 0x94b   :  { %v1708_v6 = vpop.eup %1707 }
 0x94c   :  { %v818_v7 = vsel %vm128_vm2, %v1708_v6, 0.0 }
 0x94d   :  { %819 = vadd.xlane.f32.xlu0 %v818_v7 }
 0x986   :  { %v754_v8 = vpop.f32.mrb[8].mxu1 }
 0x987   :  { %761 = vst.msk [vmem:[#allocation8] sm:$0xff] %vm76_vm1, %v754_v8  ;;  %v1571_v9 = vpop.f32.mrb[9].mxu1  ;;  %v1189_v8 = vld [vmem:[#allocation7 + $0x8] sm:$0xf] }
 0x988   :  { %v757_v10 = vpop.f32.mrb[10].mxu1  ;;  %v1194_v9 = vsel %vm192_vm3, %v1189_v8, 0 }
 0x989   :  { %v1572_v12 = vpop.f32.mrb[11].mxu1 }
 0x98e   :  { %v918_v14 = vpop.f32.mrb[16].mxu1 }
 0x98f   :  { %v1589_v15 = vpop.f32.mrb[17].mxu1  ;;  %v924_v16 = vsel %vm128_vm2, %v918_v14, -inf }
 0x990   :  { %925 = vmax.xlane.f32.xlu1 %v924_v16  ;;  %v921_v17 = vpop.f32.mrb[18].mxu1 }
 0x991   :  { %v1590_v18 = vpop.f32.mrb[19].mxu1 }
 0x9a1   :  { %824 = vrot.lane.b32.xlu1 %v1998_v38, %s1818_s22  ;;  %s1836_s22 = smov [#allocation8]  }
 0x9a2   :  { %s1402_s6 = sshll.u32 %s1836_s22, 4  ;;  %s1403_s6 = int_to_ptr.vmem [resolvable:$true] %s1402_s6 }
 0x9a3   :  { %s1789_s7 = scalar_lea.vmem %s1403_s6, 256  ;;  %p1794_p11 = scmp.lt.s32.totalorder %s1403_s6, %s1403_s6 }
 0x9a4   :  { %p1790_p10 = scmp.ne.s32.totalorder %s1403_s6, %s1789_s7  ;;  %p1795_p12 = scmp.lt.s32.totalorder %s1789_s7, %s1789_s7 }
 0x9a5   :  { %1080 = vrot.lane.b32.xlu1 %v1998_v38, %s1830_s27 }
 0x9a6   :  { %p1796_p13 = por %p1795_p12, %p1794_p11 }
 0x9a8   :  { %p1797_p0 = pnand %p1796_p13, %p1790_p10 }
 0x9a9   :  { %1078 = vrot.lane.b32.xlu1 %v2008_v11, %s1831_s28 }
 0x9da   :  { %v820_v19 = vpop.xlane.xlu0 %819 }
 0x9db   :  { %1709 = vrcp.f32 %v820_v19 }
 0x9e5   :  { %v1710_v20 = vpop.eup %1709 }
 0x9e6   :  { %v822_v23 = vmul.f32 %v1710_v20, %v1708_v6 }
 0x9e8   :  { %v823_v27 = vpack.c.bf16 %v822_v23, %v822_v23 }
 0xa1d   :  { %v926_v21 = vpop.xlane.xlu1 %925 }
 0xa1e   :  { %v927_v22 = vsub.f32 %v918_v14, %v926_v21 }
 0xa20   :  { %v928_v24 = vmul.f32 1.442695, %v927_v22 }
 0xa21   :  { %v825_v25 = vpop.permute.xlu1 %824 }
 0xa22   :  { %1711 = vpow2.f32 %v928_v24  ;;  %v830_v26 = vsel %vm192_vm3, %v825_v25, 0 }
 0xa23   :  { %1580 = vmatpush3.bf16.msra.mxu0 %v830_v26 }
 0xa24   :  { %1591 = vmatprep.subr.bf16.mxu0 %v1824_v0 }
 0xa25   :  { %v1081_v35 = vpop.permute.xlu1 %1080 }
 0xa26   :  { %1582 = vmatmul.mubr.msk.bf16.vlgmr.msra.gmra.mrb[28].mxu0 %vm128_vm2, %v823_v27  ;;  %v1086_v37 = vsel %vm128_vm2, %v1081_v35, 0 }
 0xa27   :  { %1593 = vmatprep.mubr.msk.bf16.mxu0 %vm1825_vm0, %v1824_v0 }
 0xa29   :  { %v1079_v39 = vpop.permute.xlu1 %1078 }
 0xa2c   :  { %v1712_v28 = vpop.eup %1711 }
 0xa2d   :  { %v930_v29 = vsel %vm128_vm2, %v1712_v28, 0.0 }
 0xa2e   :  { %931 = vadd.xlane.f32.xlu0 %v930_v29 }
 0xa44   :  { %936 = vrot.lane.b32.xlu0 %v1998_v38, %s1829_s26 }
 0xabb   :  { %v932_v30 = vpop.xlane.xlu0 %931 }
 0xabc   :  { %1713 = vrcp.f32 %v932_v30 }
 0xabf   :  { %v937_v31 = vpop.permute.xlu0 %936 }
 0xac0   :  { %v942_v32 = vsel %vm192_vm3, %v937_v31, 0  ;;  %v1348_v31 = vld [vmem:[#allocation7 + $0xc] sm:$0xf] }
 0xac1   :  { %1592 = vmatpush3.bf16.msra.mxu0 %v942_v32 }
 0xac2   :  { %1609 = vmatprep.subr.bf16.mxu0 %v1824_v0 }
 0xac6   :  { %v1714_v33 = vpop.eup %1713 }
 0xac7   :  { %v934_v34 = vmul.f32 %v1714_v33, %v1712_v28 }
 0xac9   :  { %v935_v36 = vpack.c.bf16 %v934_v34, %v934_v34  ;;  %v1353_v34 = vsel %vm192_vm3, %v1348_v31, 0 }
 0xacb   :  { %1594 = vmatmul.mubr.msk.bf16.vlgmr.msra.gmra.mrb[32].mxu0 %vm128_vm2, %v935_v36 }
 0xacc   :  { %1610 = vmatpush3.bf16.xpose.msra.mxu0 %v1086_v37  ;;  %1611 = vmatprep.mubr.msk.bf16.mxu0 %vm1825_vm0, %v1824_v0 }
 0xacd   :  { %1615 = vmatprep.subr.bf16.mxu0 %v1824_v0 }
 0xad3   :  { %1612 = vmatmul.mubr.msk.bf16.vlgmr.msra.gmra.mrb[36].mxu0 %vm128_vm2, %v1079_v39 }
 0xad4   :  { %1617 = vmatprep.mubr.msk.bf16.mxu0 %vm1825_vm0, %v1824_v0 }
 0xaf9   :  { %v866_v40 = vpop.f32.mrb[28].mxu0 }
 0xafa   :  { %v1583_v41 = vpop.f32.mrb[29].mxu0  ;;  %v872_v57 = vpack.c.bf16 %v866_v40, %v866_v40 }
 0xafb   :  { %v869_v42 = vpop.f32.mrb[30].mxu0 }
 0xafc   :  { %v1584_v43 = vpop.f32.mrb[31].mxu0 }
 0xb9e   :  { %v978_v47 = vpop.f32.mrb[32].mxu0 }
 0xb9f   :  { %v984_v48 = vpack.c.bf16 %v978_v47, %v978_v47  ;;  %v1595_v49 = vpop.f32.mrb[33].mxu0 }
 0xba0   :  { %v981_v51 = vpop.f32.mrb[34].mxu0 }
 0xba1   :  { %v1596_v52 = vpop.f32.mrb[35].mxu0  ;;  %1600 = vmatmul.mubr.msk.bf16.vlgmr.msra.gmra.mrb[20].mxu1 %vm128_vm2, %v984_v48 }
 0xba2   :  { %1604 = vmatpush3.bf16.msra.mxu1 %v1036_v50  ;;  %1605 = vmatprep.mubr.msk.bf16.mxu1 %vm1825_vm0, %v1824_v0 }
 0xba3   :  { %1621 = vmatprep.subr.bf16.mxu1 %v1824_v0 }
 0xba6   :  { %v1122_v13 = vpop.f32.mrb[36].mxu0 }
 0xba7   :  { %v1613_v53 = vpop.f32.mrb[37].mxu0  ;;  %v1128_v54 = vsel %vm128_vm2, %v1122_v13, -inf }
 0xba8   :  { %1129 = vmax.xlane.f32.xlu0 %v1128_v54  ;;  %v1125_v55 = vpop.f32.mrb[38].mxu0 }
 0xba9   :  { %v1614_v56 = vpop.f32.mrb[39].mxu0 }
 0xbad   :  { %1606 = vmatmul.mubr.msk.bf16.vlgmr.msra.gmra.mrb[20].mxu1 %vm128_vm2, %v872_v57 }
 0xbae   :  { %1623 = vmatprep.mubr.msk.bf16.mxu1 %vm1825_vm0, %v1824_v0  ;;  %1622 = vmatpush3.bf16.msra.mxu1 %v1194_v9 }
 0xbaf   :  { %1633 = vmatprep.subr.bf16.mxu1 %v1824_v0 }
 0xbbe   :  { %1140 = vrot.lane.b32.xlu0 %v1998_v38, %s1834_s4 }
 0xbc2   :  { %1237 = vrot.lane.b32.xlu0 %v2008_v11, %s1833_s30 }
 0xc35   :  { %v1130_v58 = vpop.xlane.xlu0 %1129 }
 0xc36   :  { %v1131_v59 = vsub.f32 %v1122_v13, %v1130_v58 }
 0xc38   :  { %v1132_v60 = vmul.f32 1.442695, %v1131_v59 }
 0xc39   :  { %v1141_v61 = vpop.permute.xlu0 %1140 }
 0xc3a   :  { %1715 = vpow2.f32 %v1132_v60  ;;  %v1146_v62 = vsel %vm192_vm3, %v1141_v61, 0 }
 0xc3b   :  { %1616 = vmatpush3.bf16.msra.mxu0 %v1146_v62 }
 0xc3c   :  { %1627 = vmatprep.subr.bf16.mxu0 %v1824_v0 }
 0xc3d   :  { %v1238_v7 = vpop.permute.xlu0 %1237 }
 0xc44   :  { %v1716_v63 = vpop.eup %1715 }
 0xc45   :  { %v1134_v1 = vsel %vm128_vm2, %v1716_v63, 0.0 }
 0xc46   :  { %1135 = vadd.xlane.f32.xlu1 %v1134_v1 }
 0xc57   :  { %1239 = vrot.lane.b32.xlu1 %v1998_v38, %s1832_s29 }
 0xcd3   :  { %v1136_v2 = vpop.xlane.xlu1 %1135 }
 0xcd4   :  { %1717 = vrcp.f32 %v1136_v2 }
 0xcd7   :  { %v1240_v4 = vpop.permute.xlu1 %1239 }
 0xcd8   :  { %v1245_v6 = vsel %vm128_vm2, %v1240_v4, 0 }
 0xcde   :  { %v1718_v11 = vpop.eup %1717 }
 0xcdf   :  { %v1138_v3 = vmul.f32 %v1718_v11, %v1716_v63 }
 0xce1   :  { %v1139_v5 = vpack.c.bf16 %v1138_v3, %v1138_v3 }
 0xce3   :  { %1618 = vmatmul.mubr.msk.bf16.vlgmr.msra.gmra.mrb[40].mxu0 %vm128_vm2, %v1139_v5 }
 0xce4   :  { %1628 = vmatpush3.bf16.xpose.msra.mxu0 %v1245_v6  ;;  %1629 = vmatprep.mubr.msk.bf16.mxu0 %vm1825_vm0, %v1824_v0 }
 0xceb   :  { %1630 = vmatmul.mubr.msk.bf16.vlgmr.msra.gmra.mrb[44].mxu0 %vm128_vm2, %v1238_v7 }
 0xdb6   :  { %v1182_v10 = vpop.f32.mrb[40].mxu0 }
 0xdb7   :  { %v1188_v12 = vpack.c.bf16 %v1182_v10, %v1182_v10  ;;  %v1619_v14 = vpop.f32.mrb[41].mxu0 }
 0xdb8   :  { %v1185_v15 = vpop.f32.mrb[42].mxu0 }
 0xdb9   :  { %v1620_v16 = vpop.f32.mrb[43].mxu0  ;;  %1624 = vmatmul.mubr.msk.bf16.vlgmr.msra.gmra.mrb[20].mxu1 %vm128_vm2, %v1188_v12 }
 0xdba   :  { %1635 = vmatprep.mubr.msk.bf16.mxu1 %vm1825_vm0, %v1824_v0 }
 0xdbe   :  { %v1281_v17 = vpop.f32.mrb[44].mxu0 }
 0xdbf   :  { %v1631_v18 = vpop.f32.mrb[45].mxu0  ;;  %v1287_v19 = vsel %vm128_vm2, %v1281_v17, -inf }
 0xdc0   :  { %1288 = vmax.xlane.f32.xlu1 %v1287_v19  ;;  %v1284_v20 = vpop.f32.mrb[46].mxu0 }
 0xdc1   :  { %v1632_v21 = vpop.f32.mrb[47].mxu0 }
 0xe4d   :  { %v1289_v22 = vpop.xlane.xlu1 %1288 }
 0xe4e   :  { %v1290_v23 = vsub.f32 %v1281_v17, %v1289_v22 }
 0xe50   :  { %v1291_v24 = vmul.f32 1.442695, %v1290_v23 }
 0xe52   :  { %1719 = vpow2.f32 %v1291_v24 }
 0xe5c   :  { %v1720_v25 = vpop.eup %1719 }
 0xe5d   :  { %v1293_v26 = vsel %vm128_vm2, %v1720_v25, 0.0 }
 0xe5e   :  { %1294 = vadd.xlane.f32.xlu0 %v1293_v26 }
 0xe74   :  { %1299 = vrot.lane.b32.xlu0 %v1998_v38, %s1835_s5 }
 0xeeb   :  { %v1295_v27 = vpop.xlane.xlu0 %1294 }
 0xeec   :  { %1721 = vrcp.f32 %v1295_v27 }
 0xeef   :  { %v1300_v28 = vpop.permute.xlu0 %1299 }
 0xef0   :  { %v1305_v29 = vsel %vm192_vm3, %v1300_v28, 0 }
 0xef1   :  { %1634 = vmatpush3.bf16.msra.mxu1 %v1305_v29 }
 0xef2   :  { %1639 = vmatprep.subr.bf16.mxu1 %v1824_v0 }
 0xef6   :  { %v1722_v30 = vpop.eup %1721 }
 0xef7   :  { %v1297_v32 = vmul.f32 %v1722_v30, %v1720_v25 }
 0xef9   :  { %v1298_v33 = vpack.c.bf16 %v1297_v32, %v1297_v32 }
 0xefb   :  { %1636 = vmatmul.mubr.msk.bf16.vlgmr.msra.gmra.mrb[24].mxu1 %vm128_vm2, %v1298_v33 }
 0xefc   :  { %1640 = vmatpush3.bf16.msra.mxu1 %v1353_v34  ;;  %1641 = vmatprep.mubr.msk.bf16.mxu1 %vm1825_vm0, %v1824_v0 }
 0xfce   :  { %v1341_v38 = vpop.f32.mrb[24].mxu1 }
 0xfcf   :  { %v1347_v35 = vpack.c.bf16 %v1341_v38, %v1341_v38  ;;  %v1637_v36 = vpop.f32.mrb[25].mxu1 }
 0xfd0   :  { %v1344_v37 = vpop.f32.mrb[26].mxu1 }
 0xfd1   :  { %v1638_v39 = vpop.f32.mrb[27].mxu1  ;;  %1642 = vmatmul.mubr.msk.bf16.vlgmr.msra.gmra.mrb[20].mxu1 %vm128_vm2, %v1347_v35 }
0x10a4   :  { %v1389_v40 = vpop.f32.mrb[20].mxu1 }
0x10a5   :  { %1396 = vst.msk [vmem:[#allocation8 + $0x8] sm:$0xff] %vm76_vm1, %v1389_v40  ;;  %v1643_v41 = vpop.f32.mrb[21].mxu1 }
0x10a6   :  { %v1392_v42 = vpop.f32.mrb[22].mxu1 }
0x10a7   :  { %1800 = shalt.err (!%p1797_p0)
}
0x10a8   :  { %s1801_s11 = scalar_lea.hbm %s2119_s3, 256 }
0x10a9   :  { %p1802_p1 = scmp.ne.s32.totalorder %s2119_s3, %s1801_s11  ;;  %p1805_p2 = scmp.lt.u32.totalorder %s1801_s11, %s2119_s3 }
0x10ab   :  { %p1807_p3 = pnand %p1805_p2, %p1802_p1 }
0x10ad   :  { %1810 = shalt.err (!%p1807_p3)
}
0x10ae   :  { %1408 = dma.vmem_to_hbm [thread:$0]  %s1403_s6, 256, %s2119_s3, [#allocation4], %s1821_s1, %s1821_s1, %s1822_s9   ;;  %v1644_v0 = vpop.f32.mrb[23].mxu1 }
0x10af   :  { %1815 = dma.done.wait [#allocation4], 256  }
0x10b0   :  { %1816 = vsyncadd [#allocation4], 4294967040 }
0x10b1   :  { %1412 = vsyncpa [#allocation3], 1 }
0x10b2   :  { %1413 = vsyncpa [#allocation6], 1 }
0x10b3   :  { %1414 = vsyncpa [#allocation4], 1 }

</bundles_post_ra>
